<compile_context>
chip_gen: v6e
topology: v6e:2x2x1
jax: 0.10.0
libtpu: 0.0.40
codegen_flags: <defaults>
</compile_context>

<pallas_src>
import jax
import jax.numpy as jnp
from jax.experimental import pallas as pl
from jax.experimental.pallas import tpu as pltpu


def _round_up(x, m):
    return (x + m - 1) // m * m


def _pad2d(a, rows, cols):
    return jnp.pad(a, ((0, rows - a.shape[0]), (0, cols - a.shape[1])))


def _vmem_limit_bytes():
    """Per-generation scoped-VMEM budget: ~3/4 of physical, capped at 96 MiB.

    v7x (64 MiB physical) -> 48 MiB;  v5e/v6e (128 MiB) -> 96 MiB.
    Conservative fallback (v7x budget) if the query is unavailable.
    """
    cap = 64 * 1024 * 1024
    try:
        cap = int(getattr(pltpu.get_tpu_info(), "vmem_capacity_bytes", cap))
    except Exception:
        pass
    return min(cap * 3 // 4, 96 * 1024 * 1024)


def _pick_tiles(n):
    """Adjacency tile sizes (tm rows x tk reduction cols) and padded N.

    Large tiles keep the grid-step overhead negligible against the bf16
    adjacency stream and amortize the per-row-tile finalize matmul.  tk is a
    multiple of tm and N is padded to a multiple of tk, so both grid extents
    are exact and (for n >= 512) the row-tile count is even, keeping the
    'parallel' axis balanced across v7x's two TensorCores.
    """
    if n >= 4096:
        tm, tk = 512, 2048
    elif n >= 1024:
        tm, tk = 512, 1024
    elif n >= 512:
        tm, tk = 256, 512
    else:
        tm, tk = 128, 128
    return tm, tk, _round_up(n, tk)


def _split_dot_f32(adj_bf16, x_f32):
    """adj_bf16 @ x_f32 with full f32 fidelity on a bf16-native MXU.

    The adjacency is exact in bf16 (0/1 values); only the feature operand is
    split into three bf16 terms (3 x 8 mantissa bits >= f32's 24), each a
    native bf16 MXU pass accumulated in f32 — instead of the ~6x f32xf32
    emulation.
    """
    hi = x_f32.astype(jnp.bfloat16)
    r1 = x_f32 - hi.astype(jnp.float32)
    mid = r1.astype(jnp.bfloat16)
    lo = (r1 - mid.astype(jnp.float32)).astype(jnp.bfloat16)
    out = jnp.dot(adj_bf16, hi, preferred_element_type=jnp.float32)
    out = out + jnp.dot(adj_bf16, mid, preferred_element_type=jnp.float32)
    out = out + jnp.dot(adj_bf16, lo, preferred_element_type=jnp.float32)
    return out


def _finalize_tile(acc_ref, deg_ref, w_ref, b_ref, out_ref):
    inv_deg = 1.0 / deg_ref[...]      # exact; approx reciprocal risks 1e-5 tol
    agg = acc_ref[...] * inv_deg      # [tm, c_in_p]
    h = jnp.dot(agg, w_ref[...], preferred_element_type=jnp.float32) + b_ref[...]
    out_ref[...] = jnp.maximum(h, 0.0).astype(out_ref.dtype)


def gcn_layer_kernel_resident(adj_ref, x_ref, w_ref, b_ref, out_ref,
                              acc_ref, deg_ref):
    """Grid point = (row tile i, reduction tile k); features VMEM-resident."""
    i = pl.program_id(0)
    k = pl.program_id(1)
    tm = acc_ref.shape[0]
    tk = adj_ref.shape[1]

    @pl.when(k == 0)
    def _init():
        # Self-loop contribution of A+I: own features, degree 1.
        row0 = pl.multiple_of(i * tm, tm)
        acc_ref[...] = x_ref[pl.ds(row0, tm), :]
        deg_ref[...] = jnp.full(deg_ref.shape, 1.0, dtype=deg_ref.dtype)

    adj = adj_ref[...]                                       # bf16 [tm, tk]
    col0 = pl.multiple_of(k * tk, tk)
    acc_ref[...] += _split_dot_f32(adj, x_ref[pl.ds(col0, tk), :])
    # Degree rides the same streamed adjacency tile (XLU reduce, f32 accum).
    deg_ref[...] += jnp.sum(adj.astype(jnp.float32), axis=-1, keepdims=True)

    @pl.when(k == pl.num_programs(1) - 1)
    def _fin():
        _finalize_tile(acc_ref, deg_ref, w_ref, b_ref, out_ref)


def gcn_layer_kernel_streamed(adj_ref, xk_ref, xi_ref, w_ref, b_ref, out_ref,
                              acc_ref, deg_ref):
    """Fallback when resident features would exceed the VMEM budget."""
    k = pl.program_id(1)

    @pl.when(k == 0)
    def _init():
        acc_ref[...] = xi_ref[...]
        deg_ref[...] = jnp.full(deg_ref.shape, 1.0, dtype=deg_ref.dtype)

    adj = adj_ref[...]
    acc_ref[...] += _split_dot_f32(adj, xk_ref[...])
    deg_ref[...] += jnp.sum(adj.astype(jnp.float32), axis=-1, keepdims=True)

    @pl.when(k == pl.num_programs(1) - 1)
    def _fin():
        _finalize_tile(acc_ref, deg_ref, w_ref, b_ref, out_ref)


def _gcn_layer(adj_bf16, x_f32, w_f32, b_f32, *, tm, tk, vmem_limit):
    """h = relu( ((A + I) @ x / deg) @ W + b ) on padded, lane-dense arrays."""
    n_pad = adj_bf16.shape[0]
    c_in_p = x_f32.shape[1]
    c_out_p = w_f32.shape[1]
    grid = (n_pad // tm, n_pad // tk)

    # Resident x needs n_pad*c_in_p*4 bytes; keep it well under the scoped
    # budget (adjacency double-buffer + acc/out tiles also live in VMEM).
    resident = n_pad * c_in_p * 4 <= vmem_limit // 3

    flops = 3 * 2 * n_pad * n_pad * c_in_p + 2 * n_pad * c_in_p * c_out_p
    x_reads = 1 if resident else (n_pad // tm + 1)
    bytes_accessed = (2 * n_pad * n_pad                       # adjacency (bf16)
                      + 4 * n_pad * c_in_p * x_reads          # features
                      + 4 * (c_in_p * c_out_p + c_out_p)      # weight + bias
                      + 4 * n_pad * c_out_p)                  # output

    scratch_shapes = [
        pltpu.VMEM((tm, c_in_p), jnp.float32),   # (A+I)@x accumulator
        pltpu.VMEM((tm, 1), jnp.float32),        # row-degree accumulator
    ]
    # NOTE: bump the adjacency spec to pipeline_mode=pl.Buffered(3) if an
    # xprof trace shows exposed DMA now that each step is 3 cheap bf16 matmuls.
    adj_spec = pl.BlockSpec((tm, tk), lambda i, k: (i, k))
    w_spec = pl.BlockSpec((c_in_p, c_out_p), lambda i, k: (0, 0))
    b_spec = pl.BlockSpec((1, c_out_p), lambda i, k: (0, 0))
    out_spec = pl.BlockSpec((tm, c_out_p), lambda i, k: (i, 0))

    common = dict(
        out_shape=jax.ShapeDtypeStruct((n_pad, c_out_p), jnp.float32),
        compiler_params=pltpu.CompilerParams(
            dimension_semantics=("parallel", "arbitrary"),
            vmem_limit_bytes=vmem_limit),
        cost_estimate=pl.CostEstimate(
            flops=flops, transcendentals=0, bytes_accessed=bytes_accessed),
    )

    if resident:
        grid_spec = pltpu.PrefetchScalarGridSpec(
            num_scalar_prefetch=0, grid=grid,
            in_specs=[adj_spec,
                      pl.BlockSpec((n_pad, c_in_p), lambda i, k: (0, 0)),
                      w_spec, b_spec],
            out_specs=out_spec,
            scratch_shapes=scratch_shapes)
        return pl.pallas_call(gcn_layer_kernel_resident, grid_spec=grid_spec,
                              **common)(adj_bf16, x_f32, w_f32, b_f32)

    grid_spec = pltpu.PrefetchScalarGridSpec(
        num_scalar_prefetch=0, grid=grid,
        in_specs=[adj_spec,
                  pl.BlockSpec((tk, c_in_p), lambda i, k: (k, 0)),   # neighbours
                  pl.BlockSpec((tm, c_in_p), lambda i, k: (i, 0)),   # self-loop
                  w_spec, b_spec],
        out_specs=out_spec,
        scratch_shapes=scratch_shapes)
    return pl.pallas_call(gcn_layer_kernel_streamed, grid_spec=grid_spec,
                          **common)(adj_bf16, x_f32, x_f32, w_f32, b_f32)


def node_encoder(node_feats, adj_matrix, w1, b1, w2, b2):
    """node_feats: [N, c_in], adj_matrix: [N, N] (0/1)
       w1: [c_out, c_in], b1: [c_out], w2: [c_out, c_out], b2: [c_out]
       (torch.nn.Linear parameter layout; transposed/padded here as glue)."""
    n, c_in = node_feats.shape
    c_out = w1.shape[0]

    tm, tk, n_p = _pick_tiles(n)
    c_in_p = _round_up(c_in, 128)      # lane-dense MXU tiles + unmasked stores
    c_out_p = _round_up(c_out, 128)
    vmem_limit = _vmem_limit_bytes()

    # Zero padding is semantically inert: padded adjacency rows/cols are 0,
    # padded weight rows/cols and bias entries are 0, so real output rows/cols
    # are unchanged (padded h1 rows touch only zero adjacency columns).
    # Cast adjacency to bf16 BEFORE padding -> no f32 N_p x N_p HBM temporary.
    adj_p = _pad2d(adj_matrix.astype(jnp.bfloat16), n_p, n_p)
    x_p = _pad2d(node_feats.astype(jnp.float32), n_p, c_in_p)
    w1_p = _pad2d(w1.T.astype(jnp.float32), c_in_p, c_out_p)
    b1_p = _pad2d(b1.reshape(1, -1).astype(jnp.float32), 1, c_out_p)
    w2_p = _pad2d(w2.T.astype(jnp.float32), c_out_p, c_out_p)
    b2_p = _pad2d(b2.reshape(1, -1).astype(jnp.float32), 1, c_out_p)

    # Two pallas_calls (one per GCN layer) — layer 2 needs the full h1.
    h1 = _gcn_layer(adj_p, x_p, w1_p, b1_p, tm=tm, tk=tk, vmem_limit=vmem_limit)
    h2 = _gcn_layer(adj_p, h1, w2_p, b2_p, tm=tm, tk=tk, vmem_limit=vmem_limit)
    return h2[:n, :c_out]


def _ref_forward(x, adj, w1, b1, w2, b2):
    # Pure-JAX reference mirroring the PyTorch forward; HIGHEST-precision
    # matmuls so the 1e-5 assert tests kernel correctness, not XLA's default
    # bf16 matmul rounding.
    hp = jax.lax.Precision.HIGHEST
    n = x.shape[0]
    self_adj = adj + jnp.eye(n, dtype=x.dtype)
    deg = self_adj.sum(-1, keepdims=True)
    h = jnp.dot(x, w1.T, precision=hp) + b1
    h = jnp.dot(self_adj, h, precision=hp) / deg
    h = jax.nn.relu(h)
    h = jnp.dot(h, w2.T, precision=hp) + b2
    h = jnp.dot(self_adj, h, precision=hp) / deg
    return jax.nn.relu(h)


if __name__ == "__main__":
    key = jax.random.PRNGKey(0)
    num_nodes, c_in, c_out = 8, 4, 32

    k_x, k_a, k_w1, k_b1, k_w2, k_b2 = jax.random.split(key, 6)

    node_feats = jax.random.normal(k_x, (num_nodes, c_in), dtype=jnp.float32)
    # 0/1 adjacency (directed edges allowed per module doc)
    adj = (jax.random.uniform(k_a, (num_nodes, num_nodes)) > 0.5).astype(jnp.float32)

    # torch.nn.Linear-style init: U(-1/sqrt(fan_in), 1/sqrt(fan_in))
    bound1 = 1.0 / (c_in ** 0.5)
    w1 = jax.random.uniform(k_w1, (c_out, c_in), minval=-bound1, maxval=bound1)
    b1 = jax.random.uniform(k_b1, (c_out,), minval=-bound1, maxval=bound1)
    bound2 = 1.0 / (c_out ** 0.5)
    w2 = jax.random.uniform(k_w2, (c_out, c_out), minval=-bound2, maxval=bound2)
    b2 = jax.random.uniform(k_b2, (c_out,), minval=-bound2, maxval=bound2)

    out = node_encoder(node_feats, adj, w1, b1, w2, b2)
    out = jax.block_until_ready(out)

    ref = _ref_forward(node_feats, adj, w1, b1, w2, b2)
    assert out.shape == (num_nodes, c_out)
    assert jnp.allclose(out, ref, atol=1e-5, rtol=1e-5)

    print("KERNEL_OK")
</pallas_src>

<mosaic_0001>
module attributes {stable_mosaic.version = 11 : i64} {
  func.func @gcn_layer_kernel_resident(%arg0: i32, %arg1: i32, %arg2: memref<128x128xbf16, #tpu.memory_space<vmem>>, %arg3: memref<128x128xf32, #tpu.memory_space<vmem>>, %arg4: memref<128x128xf32, #tpu.memory_space<vmem>>, %arg5: memref<1x128xf32, #tpu.memory_space<vmem>>, %arg6: memref<128x128xf32, #tpu.memory_space<vmem>>, %arg7: memref<128x128xf32, #tpu.memory_space<vmem>>, %arg8: memref<128x1xf32, #tpu.memory_space<vmem>>) attributes {dimension_semantics = [#tpu.dimension_semantics<parallel>, #tpu.dimension_semantics<arbitrary>], iteration_bounds = array<i64: 1, 1>, scalar_prefetch = 0 : i64, scratch_operands = 2 : i64, tpu.core_type = #tpu.core_type<tc>, window_params = [{transform_indices = @transform_0, window_bounds = array<i64: 128, 128>}, {pipeline_mode = #tpu.pipeline_mode<synchronous>, transform_indices = @transform_1, window_bounds = array<i64: 128, 128>}, {pipeline_mode = #tpu.pipeline_mode<synchronous>, transform_indices = @transform_2, window_bounds = array<i64: 128, 128>}, {pipeline_mode = #tpu.pipeline_mode<synchronous>, transform_indices = @transform_3, window_bounds = array<i64: 1, 128>}, {transform_indices = @transform_4, window_bounds = array<i64: 128, 128>}]} {
    %c0_i32 = arith.constant 0 : i32
    %0 = arith.cmpi eq, %arg1, %c0_i32 : i32
    %1 = arith.extui %0 : i1 to i32
    %c0_i32_0 = arith.constant 0 : i32
    %2 = arith.cmpi ne, %1, %c0_i32_0 : i32
    scf.if %2 {
      %c128_i32_16 = arith.constant 128 : i32
      %32 = arith.muli %arg0, %c128_i32_16 : i32
      %33 = tpu.assume_multiple %32, 128 : i32
      %34 = arith.index_cast %33 : i32 to index
      %c0_17 = arith.constant 0 : index
      %35 = vector.load %arg3[%34, %c0_17] : memref<128x128xf32, #tpu.memory_space<vmem>>, vector<128x128xf32>
      %c0_18 = arith.constant 0 : index
      %c0_19 = arith.constant 0 : index
      %36 = vector.load %arg7[%c0_18, %c0_19] : memref<128x128xf32, #tpu.memory_space<vmem>>, vector<128x128xf32>
      tpu.vector_store %arg7[%c0_18, %c0_19], %35 {strides = array<i32>} : memref<128x128xf32, #tpu.memory_space<vmem>>, vector<128x128xf32>,
      %cst_20 = arith.constant 1.000000e+00 : f32
      %37 = vector.broadcast %cst_20 : f32 to vector<128x1xf32>
      %c0_21 = arith.constant 0 : index
      %c0_22 = arith.constant 0 : index
      %38 = vector.load %arg8[%c0_21, %c0_22] : memref<128x1xf32, #tpu.memory_space<vmem>>, vector<128x1xf32>
      tpu.vector_store %arg8[%c0_21, %c0_22], %37 {strides = array<i32>} : memref<128x1xf32, #tpu.memory_space<vmem>>, vector<128x1xf32>,
    } else {
    }
    %c0 = arith.constant 0 : index
    %c0_1 = arith.constant 0 : index
    %3 = vector.load %arg2[%c0, %c0_1] : memref<128x128xbf16, #tpu.memory_space<vmem>>, vector<128x128xbf16>
    %c128_i32 = arith.constant 128 : i32
    %4 = arith.muli %arg1, %c128_i32 : i32
    %5 = tpu.assume_multiple %4, 128 : i32
    %c0_2 = arith.constant 0 : index
    %c0_3 = arith.constant 0 : index
    %6 = vector.load %arg7[%c0_2, %c0_3] : memref<128x128xf32, #tpu.memory_space<vmem>>, vector<128x128xf32>
    %7 = arith.index_cast %5 : i32 to index
    %c0_4 = arith.constant 0 : index
    %8 = vector.load %arg3[%7, %c0_4] : memref<128x128xf32, #tpu.memory_space<vmem>>, vector<128x128xf32>
    %9 = arith.truncf %8 : vector<128x128xf32> to vector<128x128xbf16>
    %10 = arith.extf %9 : vector<128x128xbf16> to vector<128x128xf32>
    %11 = arith.subf %8, %10 : vector<128x128xf32>
    %12 = arith.truncf %11 : vector<128x128xf32> to vector<128x128xbf16>
    %13 = arith.extf %12 : vector<128x128xbf16> to vector<128x128xf32>
    %14 = arith.subf %11, %13 : vector<128x128xf32>
    %15 = arith.truncf %14 : vector<128x128xf32> to vector<128x128xbf16>
    %cst = arith.constant dense<0.000000e+00> : vector<128x128xf32>
    %16 = tpu.matmul %3, %9, %cst {dimension_numbers = #tpu.dot_dimension_numbers<[1], [0], [0], [1], [0, 0, 1, 1], [], []>} : vector<128x128xbf16>, vector<128x128xbf16>, vector<128x128xf32> -> vector<128x128xf32>
    %cst_5 = arith.constant dense<0.000000e+00> : vector<128x128xf32>
    %17 = tpu.matmul %3, %12, %cst_5 {dimension_numbers = #tpu.dot_dimension_numbers<[1], [0], [0], [1], [0, 0, 1, 1], [], []>} : vector<128x128xbf16>, vector<128x128xbf16>, vector<128x128xf32> -> vector<128x128xf32>
    %18 = arith.addf %16, %17 : vector<128x128xf32>
    %cst_6 = arith.constant dense<0.000000e+00> : vector<128x128xf32>
    %19 = tpu.matmul %3, %15, %cst_6 {dimension_numbers = #tpu.dot_dimension_numbers<[1], [0], [0], [1], [0, 0, 1, 1], [], []>} : vector<128x128xbf16>, vector<128x128xbf16>, vector<128x128xf32> -> vector<128x128xf32>
    %20 = arith.addf %18, %19 : vector<128x128xf32>
    %21 = arith.addf %6, %20 : vector<128x128xf32>
    %c0_7 = arith.constant 0 : index
    %c0_8 = arith.constant 0 : index
    %22 = vector.load %arg7[%c0_7, %c0_8] : memref<128x128xf32, #tpu.memory_space<vmem>>, vector<128x128xf32>
    tpu.vector_store %arg7[%c0_7, %c0_8], %21 {strides = array<i32>} : memref<128x128xf32, #tpu.memory_space<vmem>>, vector<128x128xf32>,
    %c0_9 = arith.constant 0 : index
    %c0_10 = arith.constant 0 : index
    %23 = vector.load %arg8[%c0_9, %c0_10] : memref<128x1xf32, #tpu.memory_space<vmem>>, vector<128x1xf32>
    %24 = arith.extf %3 : vector<128x128xbf16> to vector<128x128xf32>
    %cst_11 = arith.constant dense<0.000000e+00> : vector<128xf32>
    %25 = vector.multi_reduction <add>, %24, %cst_11 [1] : vector<128x128xf32> to vector<128xf32>
    %26 = vector.shape_cast %25 : vector<128xf32> to vector<128x1xf32>
    %27 = arith.addf %23, %26 : vector<128x1xf32>
    %c0_12 = arith.constant 0 : index
    %c0_13 = arith.constant 0 : index
    %28 = vector.load %arg8[%c0_12, %c0_13] : memref<128x1xf32, #tpu.memory_space<vmem>>, vector<128x1xf32>
    tpu.vector_store %arg8[%c0_12, %c0_13], %27 {strides = array<i32>} : memref<128x1xf32, #tpu.memory_space<vmem>>, vector<128x1xf32>,
    %c0_i32_14 = arith.constant 0 : i32
    %29 = arith.cmpi eq, %arg1, %c0_i32_14 : i32
    %30 = arith.extui %29 : i1 to i32
    %c0_i32_15 = arith.constant 0 : i32
    %31 = arith.cmpi ne, %30, %c0_i32_15 : i32
    scf.if %31 {
      %c0_16 = arith.constant 0 : index
      %c0_17 = arith.constant 0 : index
      %32 = vector.load %arg8[%c0_16, %c0_17] : memref<128x1xf32, #tpu.memory_space<vmem>>, vector<128x1xf32>
      %cst_18 = arith.constant 1.000000e+00 : f32
      %33 = vector.broadcast %cst_18 : f32 to vector<128x1xf32>
      %34 = arith.divf %33, %32 : vector<128x1xf32>
      %c0_19 = arith.constant 0 : index
      %c0_20 = arith.constant 0 : index
      %35 = vector.load %arg7[%c0_19, %c0_20] : memref<128x128xf32, #tpu.memory_space<vmem>>, vector<128x128xf32>
      %36 = vector.broadcast %34 : vector<128x1xf32> to vector<128x128xf32>
      %37 = arith.mulf %35, %36 : vector<128x128xf32>
      %c0_21 = arith.constant 0 : index
      %c0_22 = arith.constant 0 : index
      %38 = vector.load %arg4[%c0_21, %c0_22] : memref<128x128xf32, #tpu.memory_space<vmem>>, vector<128x128xf32>
      %cst_23 = arith.constant dense<0.000000e+00> : vector<128x128xf32>
      %39 = tpu.matmul %37, %38, %cst_23 {dimension_numbers = #tpu.dot_dimension_numbers<[1], [0], [0], [1], [0, 0, 1, 1], [], []>} : vector<128x128xf32>, vector<128x128xf32>, vector<128x128xf32> -> vector<128x128xf32>
      %c0_24 = arith.constant 0 : index
      %c0_25 = arith.constant 0 : index
      %40 = vector.load %arg5[%c0_24, %c0_25] : memref<1x128xf32, #tpu.memory_space<vmem>>, vector<1x128xf32>
      %41 = vector.broadcast %40 : vector<1x128xf32> to vector<128x128xf32>
      %42 = arith.addf %39, %41 : vector<128x128xf32>
      %cst_26 = arith.constant 0.000000e+00 : f32
      %43 = vector.broadcast %cst_26 : f32 to vector<128x128xf32>
      %44 = arith.maximumf %42, %43 : vector<128x128xf32>
      %c0_27 = arith.constant 0 : index
      %c0_28 = arith.constant 0 : index
      %45 = vector.load %arg6[%c0_27, %c0_28] : memref<128x128xf32, #tpu.memory_space<vmem>>, vector<128x128xf32>
      tpu.vector_store %arg6[%c0_27, %c0_28], %44 {strides = array<i32>} : memref<128x128xf32, #tpu.memory_space<vmem>>, vector<128x128xf32>,
    } else {
    }
    return
  }
  func.func @transform_0(%arg0: i32, %arg1: i32) -> (i32, i32) {
    %c0_i32 = arith.constant 0 : i32
    return %arg0, %arg1 : i32, i32
  }
  func.func @transform_1(%arg0: i32, %arg1: i32) -> (i32, i32) {
    %c0_i32 = arith.constant 0 : i32
    %c0_i32_0 = arith.constant 0 : i32
    %c0_i32_1 = arith.constant 0 : i32
    return %c0_i32, %c0_i32_0 : i32, i32
  }
  func.func @transform_2(%arg0: i32, %arg1: i32) -> (i32, i32) {
    %c0_i32 = arith.constant 0 : i32
    %c0_i32_0 = arith.constant 0 : i32
    %c0_i32_1 = arith.constant 0 : i32
    return %c0_i32, %c0_i32_0 : i32, i32
  }
  func.func @transform_3(%arg0: i32, %arg1: i32) -> (i32, i32) {
    %c0_i32 = arith.constant 0 : i32
    %c0_i32_0 = arith.constant 0 : i32
    %c0_i32_1 = arith.constant 0 : i32
    return %c0_i32, %c0_i32_0 : i32, i32
  }
  func.func @transform_4(%arg0: i32, %arg1: i32) -> (i32, i32) {
    %c0_i32 = arith.constant 0 : i32
    %c0_i32_0 = arith.constant 0 : i32
    return %arg0, %c0_i32 : i32, i32
  }
}

</mosaic_0001>

<bundles_post_ra>
// kernel: tpu_custom_call.1
= control target key start
LH: loop header
LB: loop body
LE: loop exit
PB: predicated region body
PF: predicated region fallthrough
CT: control target
= control target key end

     0   :  { %9 = vsyncpa [#allocation5], 0  ;;  %s1865_s0 = inlined_call_operand.hbm [shape: bf16[128,128], index: 0, kind: input, shape index: {}]   ;;  %s1866_s1 = inlined_call_operand.hbm [shape: f32[128,128], index: 1, kind: input, shape index: {}]   ;;  %s1867_s2 = inlined_call_operand.hbm [shape: f32[128,128], index: 2, kind: input, shape index: {}]   ;;  %s1868_s3 = inlined_call_operand.vmem [shape: f32[1,128], index: 3, kind: input, shape index: {}]   ;;  %s1869_s4 = inlined_call_operand.hbm [shape: f32[128,128], index: 4, kind: output, shape index: {}]  }
   0x1   :  { %10 = vsyncpa [#allocation8], 0 }
   0x2   :  { %11 = vsyncpa [#allocation6], 0  ;;  %s1506_s15 = smov [#allocation7]  }
   0x3   :  { %s29_s16 = sshll.u32 %s1506_s15, 4  ;;  %s30_s16 = int_to_ptr.vmem [resolvable:$true] %s29_s16 }
   0x4   :  { %s1428_s17 = scalar_lea.vmem %s30_s16, 2048  ;;  %p1433_p1 = scmp.lt.s32.totalorder %s30_s16, %s30_s16 }
   0x5   :  { %p1429_p0 = scmp.ne.s32.totalorder %s30_s16, %s1428_s17  ;;  %p1434_p2 = scmp.lt.s32.totalorder %s1428_s17, %s1428_s17 }
   0x7   :  { %p1435_p3 = por %p1434_p2, %p1433_p1 }
   0x9   :  { %p1436_p4 = pnand %p1435_p3, %p1429_p0 }
   0xb   :  { %1439 = shalt.err (!%p1436_p4)
}
   0xc   :  { %s1507_s18 = smov 128   ;;  %s1508_s19 = smov 8  }
   0xd   :  { %35 = dma.hbm_to_vmem [thread:$0]  %s1866_s1, 2048, %s30_s16, [#allocation8], %s1507_s18, %s1507_s18, %s1508_s19  }
   0xe   :  { %s1509_s22 = smov [#allocation4]  }
   0xf   :  { %s17_s23 = sshll.u32 %s1509_s22, 4  ;;  %s18_s23 = int_to_ptr.vmem [resolvable:$true] %s17_s23 }
  0x10   :  { %s1448_s24 = scalar_lea.vmem %s18_s23, 1024  ;;  %p1453_p6 = scmp.lt.s32.totalorder %s18_s23, %s18_s23 }
  0x11   :  { %p1449_p5 = scmp.ne.s32.totalorder %s18_s23, %s1448_s24  ;;  %p1454_p7 = scmp.lt.s32.totalorder %s1448_s24, %s1448_s24 }
  0x13   :  { %p1455_p8 = por %p1454_p7, %p1453_p6 }
  0x15   :  { %p1456_p9 = pnand %p1455_p8, %p1449_p5 }
  0x17   :  { %1459 = shalt.err (!%p1456_p9)
}
  0x18   :  { %s1510_s25 = smov 64   ;;  %s1511_s26 = smov 4  }
  0x19   :  { %23 = dma.hbm_to_vmem [thread:$0]  %s1865_s0, 1024, %s18_s23, [#allocation5], %s1510_s25, %s1510_s25, %s1511_s26  }
  0x1a   :  { %s1512_s29 = smov [#allocation9]  }
  0x1b   :  { %s41_s30 = sshll.u32 %s1512_s29, 4  ;;  %s42_s30 = int_to_ptr.vmem [resolvable:$true] %s41_s30 }
  0x1c   :  { %s1468_s1 = scalar_lea.vmem %s42_s30, 2048  ;;  %p1473_p11 = scmp.lt.s32.totalorder %s42_s30, %s42_s30 }
  0x1d   :  { %p1469_p10 = scmp.ne.s32.totalorder %s42_s30, %s1468_s1  ;;  %p1474_p12 = scmp.lt.s32.totalorder %s1468_s1, %s1468_s1 }
  0x1f   :  { %p1475_p13 = por %p1474_p12, %p1473_p11 }
  0x21   :  { %p1476_p0 = pnand %p1475_p13, %p1469_p10 }
  0x23   :  { %1479 = shalt.err (!%p1476_p0)
}
  0x24   :  { %47 = dma.hbm_to_vmem [thread:$0]  %s1867_s2, 2048, %s42_s30, [#allocation8], %s1507_s18, %s1507_s18, %s1508_s19  }
  0x25   :  { %1500 = dma.done.wait [#allocation5], 1024  }
  0x26   :  { %1501 = vsyncadd [#allocation5], 4294966272 }
  0x27   :  { %1502 = dma.done.wait [#allocation8], 4096  }
  0x28   :  { %1503 = vsyncadd [#allocation8], 4294963200  ;;  %vm98_vm0 = vcmask 7168   ;;  %v1513_v0 = vmov 1.0   ;;  %v1572_v1 = vld [vmem:[#allocation4 + $0x8] sm:$0xff]   ;;  %v1574_v2 = vld [vmem:[#allocation4] sm:$0xff]  }
  0x29   :  { %101 = vst.msk [vmem:[#allocation3 + $0x10] sm:$0xff] %vm98_vm0, %v1513_v0  ;;  %99 = vst.msk [vmem:[#allocation3] sm:$0xff] %vm98_vm0, %v1513_v0  ;;  %v163_v3 = vld [vmem:[#allocation7 + $0x70] sm:$0xff]  ;;  %v658_v4 = vunpack.c.l.bf16 %v1572_v1  ;;  %v656_v5 = vunpack.c.l.bf16 %v1574_v2  ;;  %v164_v6 = vld [vmem:[#allocation7 + $0x78] sm:$0xff]  ;;  %v659_v12 = vunpack.c.h.bf16 %v1572_v1  ;;  %v657_v13 = vunpack.c.h.bf16 %v1574_v2  ;;  %1223 = vmatprep.mubr.bf16.mxu0 %v1574_v2  ;;  %1255 = vmatprep.mubr.bf16.mxu1 %v1574_v2 }
  0x2a   :  { %100 = vst.msk [vmem:[#allocation3 + $0x8] sm:$0xff] %vm98_vm0, %v1513_v0  ;;  %102 = vst.msk [vmem:[#allocation3 + $0x18] sm:$0xff] %vm98_vm0, %v1513_v0  ;;  %v1578_v7 = vld [vmem:[#allocation4 + $0x10] sm:$0xff]   ;;  %v161_v8 = vld [vmem:[#allocation7 + $0x60] sm:$0xff]  ;;  %v172_v9 = vpack.c.bf16 %v164_v6, %v163_v3 }
  0x2b   :  { %103 = vst.msk [vmem:[#allocation3 + $0x20] sm:$0xff] %vm98_vm0, %v1513_v0  ;;  %104 = vst.msk [vmem:[#allocation3 + $0x28] sm:$0xff] %vm98_vm0, %v1513_v0  ;;  %v162_v10 = vld [vmem:[#allocation7 + $0x68] sm:$0xff]  ;;  %v159_v11 = vld [vmem:[#allocation7 + $0x50] sm:$0xff]  ;;  %676 = vadd.xlane.f32.xlu1 %v658_v4  ;;  %672 = vadd.xlane.f32.xlu0 %v656_v5  ;;  %v661_v19 = vunpack.c.h.bf16 %v1578_v7  ;;  %v660_v24 = vunpack.c.l.bf16 %v1578_v7 }
  0x2c   :  { %105 = vst.msk [vmem:[#allocation3 + $0x30] sm:$0xff] %vm98_vm0, %v1513_v0  ;;  %106 = vst.msk [vmem:[#allocation3 + $0x38] sm:$0xff] %vm98_vm0, %v1513_v0  ;;  %v171_v14 = vpack.c.bf16 %v162_v10, %v161_v8  ;;  %v1582_v15 = vld [vmem:[#allocation7 + $0x58] sm:$0xff]  ;;  %v1584_v16 = vld [vmem:[#allocation7 + $0x40] sm:$0xff]  ;;  %v187_v17 = vunpack.c.l.bf16 %v172_v9  ;;  %v188_v18 = vunpack.c.h.bf16 %v172_v9  ;;  %1239 = vmatprep.subr.bf16.mxu1 %v172_v9 }
  0x2d   :  { %107 = vst.msk [vmem:[#allocation3 + $0x40] sm:$0xff] %vm98_vm0, %v1513_v0  ;;  %108 = vst.msk [vmem:[#allocation3 + $0x48] sm:$0xff] %vm98_vm0, %v1513_v0  ;;  %v170_v20 = vpack.c.bf16 %v1582_v15, %v159_v11  ;;  %v1588_v21 = vld [vmem:[#allocation7 + $0x48] sm:$0xff]  ;;  %v1594_v26 = vld [vmem:[#allocation7 + $0x30] sm:$0xff]  ;;  %1240 = vmatpush3.bf16.msra.mxu1 %v172_v9 }
  0x2e   :  { %109 = vst.msk [vmem:[#allocation3 + $0x50] sm:$0xff] %vm98_vm0, %v1513_v0  ;;  %110 = vst.msk [vmem:[#allocation3 + $0x58] sm:$0xff] %vm98_vm0, %v1513_v0  ;;  %v185_v22 = vunpack.c.l.bf16 %v171_v14  ;;  %v186_v23 = vunpack.c.h.bf16 %v171_v14  ;;  %v169_v25 = vpack.c.bf16 %v1588_v21, %v1584_v16  ;;  %v1596_v27 = vld [vmem:[#allocation7 + $0x38] sm:$0xff]  ;;  %v1599_v28 = vsub.f32 %v163_v3, %v187_v17  ;;  %1241 = vmatprep.subr.bf16.mxu1 %v171_v14  ;;  %v1624_v42 = vld [vmem:[#allocation7 + $0x20] sm:$0xff] }
  0x2f   :  { %111 = vst.msk [vmem:[#allocation3 + $0x60] sm:$0xff] %vm98_vm0, %v1513_v0  ;;  %112 = vst.msk [vmem:[#allocation3 + $0x68] sm:$0xff] %vm98_vm0, %v1513_v0  ;;  %v1601_v29 = vsub.f32 %v164_v6, %v188_v18  ;;  %v183_v30 = vunpack.c.l.bf16 %v170_v20  ;;  %v184_v31 = vunpack.c.h.bf16 %v170_v20  ;;  %678 = vadd.xlane.f32.xlu1 %v659_v12  ;;  %674 = vadd.xlane.f32.xlu0 %v657_v13  ;;  %v1611_v37 = vld [vmem:[#allocation4 + $0x18] sm:$0xff]   ;;  %v1626_v43 = vld [vmem:[#allocation7 + $0x28] sm:$0xff] }
  0x30   :  { %113 = vst.msk [vmem:[#allocation3 + $0x70] sm:$0xff] %vm98_vm0, %v1513_v0  ;;  %114 = vst.msk [vmem:[#allocation3 + $0x78] sm:$0xff] %vm98_vm0, %v1513_v0  ;;  %v1603_v32 = vsub.f32 %v161_v8, %v185_v22  ;;  %v1605_v33 = vsub.f32 %v162_v10, %v186_v23  ;;  %v181_v34 = vunpack.c.l.bf16 %v169_v25  ;;  %v182_v35 = vunpack.c.h.bf16 %v169_v25  ;;  %v1639_v49 = vld [vmem:[#allocation4 + $0x20] sm:$0xff]   ;;  %v1647_v53 = vld [vmem:[#allocation7 + $0x10] sm:$0xff] }
  0x31   :  { %v1609_v36 = vpack.c.bf16 %v1601_v29, %v1599_v28  ;;  %v1613_v38 = vsub.f32 %v159_v11, %v183_v30  ;;  %v1616_v39 = vsub.f32 %v1582_v15, %v184_v31  ;;  %v168_v40 = vpack.c.bf16 %v1596_v27, %v1594_v26  ;;  %1242 = vmatpush3.bf16.msra.mxu1 %v171_v14  ;;  %v1649_v54 = vld [vmem:[#allocation7 + $0x18] sm:$0xff]  ;;  %v1666_v60 = vld [vmem:[#allocation4 + $0x28] sm:$0xff]   ;;  %v1669_v0 = vld [vmem:[#allocation7] sm:$0xff] }
  0x32   :  { %v1622_v41 = vpack.c.bf16 %v1605_v33, %v1603_v32  ;;  %1243 = vmatprep.subr.bf16.mxu1 %v170_v20  ;;  %v663_v44 = vunpack.c.h.bf16 %v1611_v37  ;;  %v1632_v45 = vsub.f32 %v1584_v16, %v181_v34  ;;  %v1642_v50 = vsub.f32 %v1588_v21, %v182_v35  ;;  %v1671_v3 = vld [vmem:[#allocation7 + $0x8] sm:$0xff]  ;;  %v1682_v9 = vld [vmem:[#allocation4 + $0x30] sm:$0xff]  }
  0x33   :  { %1207 = vmatprep.subr.bf16.mxu0 %v1609_v36  ;;  %682 = vadd.xlane.f32.xlu1 %v661_v19  ;;  %v179_v46 = vunpack.c.l.bf16 %v168_v40  ;;  %v180_v47 = vunpack.c.h.bf16 %v168_v40  ;;  %v1637_v48 = vpack.c.bf16 %v1616_v39, %v1613_v38  ;;  %v662_v51 = vunpack.c.l.bf16 %v1611_v37 }
  0x34   :  { %1208 = vmatpush3.bf16.msra.mxu0 %v1609_v36  ;;  %680 = vadd.xlane.f32.xlu0 %v660_v24  ;;  %v167_v52 = vpack.c.bf16 %v1626_v43, %v1624_v42  ;;  %v665_v55 = vunpack.c.h.bf16 %v1639_v49  ;;  %v166_v58 = vpack.c.bf16 %v1649_v54, %v1647_v53  ;;  %v1664_v59 = vpack.c.bf16 %v1642_v50, %v1632_v45 }
  0x35   :  { %1209 = vmatprep.subr.bf16.mxu0 %v1622_v41  ;;  %1244 = vmatpush3.bf16.msra.mxu1 %v170_v20  ;;  %v1654_v56 = vsub.f32 %v1594_v26, %v179_v46  ;;  %v1657_v57 = vsub.f32 %v1596_v27, %v180_v47  ;;  %v664_v63 = vunpack.c.l.bf16 %v1639_v49  ;;  %v667_v4 = vunpack.c.h.bf16 %v1666_v60  ;;  %v1698_v20 = vld [vmem:[#allocation4 + $0x38] sm:$0xff]  }
  0x36   :  { %1245 = vmatprep.subr.bf16.mxu1 %v169_v25  ;;  %v177_v61 = vunpack.c.l.bf16 %v167_v52  ;;  %v178_v62 = vunpack.c.h.bf16 %v167_v52  ;;  %v175_v6 = vunpack.c.l.bf16 %v166_v58  ;;  %v165_v8 = vpack.c.bf16 %v1671_v3, %v1669_v0 }
  0x37   :  { %686 = vadd.xlane.f32.xlu1 %v663_v44  ;;  %v1677_v5 = vpack.c.bf16 %v1657_v57, %v1654_v56  ;;  %v176_v12 = vunpack.c.h.bf16 %v166_v58  ;;  %v666_v13 = vunpack.c.l.bf16 %v1666_v60  ;;  %v669_v14 = vunpack.c.h.bf16 %v1682_v9 }
  0x38   :  { %1210 = vmatpush3.bf16.msra.mxu0 %v1622_v41  ;;  %684 = vadd.xlane.f32.xlu0 %v662_v51  ;;  %v1685_v10 = vsub.f32 %v1624_v42, %v177_v61  ;;  %v1688_v11 = vsub.f32 %v1626_v43, %v178_v62  ;;  %v173_v17 = vunpack.c.l.bf16 %v165_v8  ;;  %v174_v18 = vunpack.c.h.bf16 %v165_v8 }
  0x39   :  { %1211 = vmatprep.subr.bf16.mxu0 %v1637_v48  ;;  %1246 = vmatpush3.bf16.msra.mxu1 %v169_v25  ;;  %v1701_v22 = vsub.f32 %v1647_v53, %v175_v6  ;;  %v1704_v23 = vsub.f32 %v1649_v54, %v176_v12  ;;  %v668_v24 = vunpack.c.l.bf16 %v1682_v9  ;;  %v671_v25 = vunpack.c.h.bf16 %v1698_v20 }
  0x3a   :  { %1247 = vmatprep.subr.bf16.mxu1 %v168_v40  ;;  %v1696_v19 = vpack.c.bf16 %v1688_v11, %v1685_v10  ;;  %v1710_v30 = vsub.f32 %v1669_v0, %v173_v17  ;;  %v227_v31 = vunpack.c.l.bf16 %v1609_v36  ;;  %v1719_v35 = vsub.f32 %v1671_v3, %v174_v18 }
  0x3b   :  { %690 = vadd.xlane.f32.xlu1 %v665_v55  ;;  %v1716_v34 = vpack.c.bf16 %v1704_v23, %v1701_v22  ;;  %v670_v44 = vunpack.c.l.bf16 %v1698_v20  ;;  %v223_v55 = vunpack.c.l.bf16 %v1637_v48  ;;  %v224_v62 = vunpack.c.h.bf16 %v1637_v48 }
  0x3c   :  { %1212 = vmatpush3.bf16.msra.mxu0 %v1637_v48  ;;  %688 = vadd.xlane.f32.xlu0 %v664_v63  ;;  %v243_v46 = vsub.f32 %v1599_v28, %v227_v31  ;;  %v1728_v47 = vpack.c.bf16 %v1719_v35, %v1710_v30  ;;  %v219_v48 = vunpack.c.l.bf16 %v1677_v5  ;;  %v218_v17 = vunpack.c.h.bf16 %v1696_v19 }
  0x3d   :  { %1213 = vmatprep.subr.bf16.mxu0 %v1664_v59  ;;  %1248 = vmatpush3.bf16.msra.mxu1 %v168_v40  ;;  %v228_v40 = vunpack.c.h.bf16 %v1609_v36  ;;  %v225_v36 = vunpack.c.l.bf16 %v1622_v41  ;;  %v215_v18 = vunpack.c.l.bf16 %v1716_v34 }
  0x3e   :  { %1249 = vmatprep.subr.bf16.mxu1 %v167_v52 }
  0x3f   :  { %694 = vadd.xlane.f32.xlu1 %v667_v4  ;;  %v244_v51 = vsub.f32 %v1601_v29, %v228_v40  ;;  %v1514_v29 = vmov 0   ;;  %v239_v4 = vsub.f32 %v1613_v38, %v223_v55  ;;  %v217_v38 = vunpack.c.l.bf16 %v1696_v19  ;;  %v645_v55 = vld [vmem:[#allocation3 + $0x28] sm:$0xff] }
  0x40   :  { %1214 = vmatpush3.bf16.msra.mxu0 %v1664_v59  ;;  %692 = vadd.xlane.f32.xlu0 %v666_v13  ;;  %v220_v13 = vunpack.c.h.bf16 %v1677_v5 }
  0x41   :  { %1215 = vmatprep.subr.bf16.mxu0 %v1677_v5  ;;  %1250 = vmatpush3.bf16.msra.mxu1 %v167_v52  ;;  %v226_v52 = vunpack.c.h.bf16 %v1622_v41  ;;  %v252_v28 = vpack.c.bf16 %v244_v51, %v243_v46  ;;  %v221_v41 = vunpack.c.l.bf16 %v1664_v59 }
  0x42   :  { %1251 = vmatprep.subr.bf16.mxu1 %v166_v58  ;;  %1369 = vset.pattern.permute.xlu0 %v1514_v29 }
  0x43   :  { %698 = vadd.xlane.f32.xlu1 %v669_v14  ;;  %v242_v61 = vsub.f32 %v1605_v33, %v226_v52  ;;  %v222_v33 = vunpack.c.h.bf16 %v1664_v59  ;;  %v235_v59 = vsub.f32 %v1654_v56, %v219_v48  ;;  %v236_v14 = vsub.f32 %v1657_v57, %v220_v13  ;;  %v910_v52 = vld [vmem:[#allocation9 + $0x50] sm:$0xff]  ;;  %v907_v48 = vld [vmem:[#allocation9 + $0x38] sm:$0xff] }
  0x44   :  { %1216 = vmatpush3.bf16.msra.mxu0 %v1677_v5  ;;  %696 = vadd.xlane.f32.xlu0 %v668_v24  ;;  %v234_v5 = vsub.f32 %v1688_v11, %v218_v17  ;;  %v216_v24 = vunpack.c.h.bf16 %v1716_v34  ;;  %v213_v56 = vunpack.c.l.bf16 %v1728_v47  ;;  %v906_v13 = vld [vmem:[#allocation9 + $0x30] sm:$0xff]  ;;  %v648_v17 = vld [vmem:[#allocation3 + $0x40] sm:$0xff] }
  0x45   :  { %1217 = vmatprep.subr.bf16.mxu0 %v1696_v19  ;;  %1252 = vmatpush3.bf16.msra.mxu1 %v166_v58  ;;  %v241_v58 = vsub.f32 %v1603_v32, %v225_v36  ;;  %v240_v32 = vsub.f32 %v1616_v39, %v224_v62  ;;  %v238_v12 = vsub.f32 %v1642_v50, %v222_v33  ;;  %v646_v33 = vld [vmem:[#allocation3 + $0x30] sm:$0xff] }
  0x46   :  { %1253 = vmatprep.subr.bf16.mxu1 %v165_v8  ;;  %1370 = vset.pattern.permute.xlu1 %v1514_v29  ;;  %v248_v50 = vpack.c.bf16 %v236_v14, %v235_v59  ;;  %v229_v31 = vsub.f32 %v1710_v30, %v213_v56  ;;  %v642_v30 = vld [vmem:[#allocation3 + $0x10] sm:$0xff]  ;;  %v651_v56 = vld [vmem:[#allocation3 + $0x58] sm:$0xff] }
  0x47   :  { %702 = vadd.xlane.f32.xlu1 %v671_v25  ;;  %v251_v63 = vpack.c.bf16 %v242_v61, %v241_v58  ;;  %v250_v6 = vpack.c.bf16 %v240_v32, %v239_v4  ;;  %v214_v25 = vunpack.c.h.bf16 %v1728_v47  ;;  %v909_v58 = vld [vmem:[#allocation9 + $0x48] sm:$0xff] }
  0x48   :  { %1218 = vmatpush3.bf16.msra.mxu0 %v1696_v19  ;;  %700 = vadd.xlane.f32.xlu0 %v670_v44  ;;  %v231_v19 = vsub.f32 %v1701_v22, %v215_v18  ;;  %v643_v44 = vld [vmem:[#allocation3 + $0x18] sm:$0xff] }
  0x49   :  { %1219 = vmatprep.subr.bf16.mxu0 %v1716_v34  ;;  %1254 = vmatpush3.bf16.msra.mxu1 %v165_v8  ;;  %v237_v8 = vsub.f32 %v1632_v45, %v221_v41  ;;  %v233_v45 = vsub.f32 %v1685_v10, %v217_v38  ;;  %v232_v10 = vsub.f32 %v1704_v23, %v216_v24  ;;  %v915_v23 = vld [vmem:[#allocation9 + $0x78] sm:$0xff]  ;;  %v908_v41 = vld [vmem:[#allocation9 + $0x40] sm:$0xff]  ;;  %v649_v38 = vld [vmem:[#allocation3 + $0x48] sm:$0xff] }
  0x4a   :  { %1303 = vmatprep.subr.mxu1 %v915_v23  ;;  %v904_v24 = vld [vmem:[#allocation9 + $0x20] sm:$0xff] }
  0x4b   :  { %v249_v39 = vpack.c.bf16 %v238_v12, %v237_v8  ;;  %v247_v57 = vpack.c.bf16 %v234_v5, %v233_v45  ;;  %v246_v11 = vpack.c.bf16 %v232_v10, %v231_v19  ;;  %v905_v45 = vld [vmem:[#allocation9 + $0x28] sm:$0xff]  ;;  %v650_v10 = vld [vmem:[#allocation3 + $0x50] sm:$0xff] }
  0x4c   :  { %1220 = vmatpush3.bf16.msra.mxu0 %v1716_v34  ;;  %1256 = vmatmul.mubr.bf16.vlgmr.msra.gmra.mxu1 %v1572_v1  ;;  %v230_v34 = vsub.f32 %v1719_v35, %v214_v25  ;;  %v640_v35 = vld [vmem:[#allocation3] sm:$0xff]  ;;  %v903_v25 = vld [vmem:[#allocation9 + $0x18] sm:$0xff] }
  0x4d   :  { %1221 = vmatprep.subr.bf16.mxu0 %v1728_v47  ;;  %1259 = vmatprep.mubr.bf16.mxu1 %v1578_v7 }
  0x4e   :  { %v245_v22 = vpack.c.bf16 %v230_v34, %v229_v31  ;;  %1304 = vmatpush3.msra.mxu1 %v915_v23  ;;  %v653_v23 = vld [vmem:[#allocation3 + $0x68] sm:$0xff] }
  0x50   :  { %1222 = vmatpush3.bf16.msra.mxu0 %v1728_v47 }
  0x51   :  { %1271 = vmatprep.subr.bf16.mxu0 %v252_v28 }
  0x53   :  { %1224 = vmatmul.mubr.bf16.vlgmr.msra.gmra.mxu0 %v1572_v1 }
  0x54   :  { %1272 = vmatpush3.bf16.msra.mxu0 %v252_v28  ;;  %1227 = vmatprep.mubr.bf16.mxu0 %v1578_v7  ;;  %v644_v28 = vld [vmem:[#allocation3 + $0x20] sm:$0xff] }
  0x55   :  { %1273 = vmatprep.subr.bf16.mxu0 %v251_v63  ;;  %1260 = vmatmul.mubr.bf16.gmra.mxu1 %v1611_v37 }
  0x56   :  { %1263 = vmatprep.mubr.bf16.mxu1 %v1639_v49 }
  0x58   :  { %1274 = vmatpush3.bf16.msra.mxu0 %v251_v63  ;;  %v647_v63 = vld [vmem:[#allocation3 + $0x38] sm:$0xff] }
  0x59   :  { %1275 = vmatprep.subr.bf16.mxu0 %v250_v6 }
  0x5b   :  { %1228 = vmatmul.mubr.bf16.gmra.mxu0 %v1611_v37 }
  0x5c   :  { %1276 = vmatpush3.bf16.msra.mxu0 %v250_v6  ;;  %1231 = vmatprep.mubr.bf16.mxu0 %v1639_v49 }
  0x5d   :  { %1277 = vmatprep.subr.bf16.mxu0 %v249_v39  ;;  %1264 = vmatmul.mubr.bf16.gmra.mxu1 %v1666_v60 }
  0x5e   :  { %1267 = vmatprep.mubr.bf16.mxu1 %v1682_v9 }
  0x60   :  { %1278 = vmatpush3.bf16.msra.mxu0 %v249_v39 }
  0x61   :  { %1279 = vmatprep.subr.bf16.mxu0 %v248_v50 }
  0x63   :  { %1232 = vmatmul.mubr.bf16.gmra.mxu0 %v1666_v60 }
  0x64   :  { %1280 = vmatpush3.bf16.msra.mxu0 %v248_v50  ;;  %1235 = vmatprep.mubr.bf16.mxu0 %v1682_v9 }
  0x65   :  { %1281 = vmatprep.subr.bf16.mxu0 %v247_v57  ;;  %1268 = vmatmul.mubr.bf16.gmra.mxu1 %v1698_v20 }
  0x68   :  { %1282 = vmatpush3.bf16.msra.mxu0 %v247_v57 }
  0x69   :  { %1283 = vmatprep.subr.bf16.mxu0 %v246_v11 }
  0x6b   :  { %1236 = vmatmul.mubr.bf16.gmra.mxu0 %v1698_v20 }
  0x6c   :  { %1284 = vmatpush3.bf16.msra.mxu0 %v246_v11  ;;  %1287 = vmatprep.mubr.bf16.mxu0 %v1574_v2  ;;  %v914_v2 = vld [vmem:[#allocation9 + $0x70] sm:$0xff] }
  0x6d   :  { %1285 = vmatprep.subr.bf16.mxu0 %v245_v22  ;;  %1305 = vmatprep.subr.mxu1 %v914_v2 }
  0x6e   :  { %1306 = vmatpush3.msra.mxu1 %v914_v2 }
  0x70   :  { %1286 = vmatpush3.bf16.msra.mxu0 %v245_v22  ;;  %v902_v22 = vld [vmem:[#allocation9 + $0x10] sm:$0xff] }
  0x73   :  { %1288 = vmatmul.mubr.bf16.vlgmr.msra.gmra.mxu0 %v1572_v1  ;;  %v913_v1 = vld [vmem:[#allocation9 + $0x68] sm:$0xff] }
  0x74   :  { %1291 = vmatprep.mubr.bf16.mxu0 %v1578_v7  ;;  %1307 = vmatprep.subr.mxu1 %v913_v1 }
  0x75   :  { %1308 = vmatpush3.msra.mxu1 %v913_v1  ;;  %v901_v1 = vld [vmem:[#allocation9 + $0x8] sm:$0xff] }
  0x7b   :  { %1292 = vmatmul.mubr.bf16.gmra.mxu0 %v1611_v37 }
  0x7c   :  { %1295 = vmatprep.mubr.bf16.mxu0 %v1639_v49 }
  0x83   :  { %1296 = vmatmul.mubr.bf16.gmra.mxu0 %v1666_v60  ;;  %v912_v60 = vld [vmem:[#allocation9 + $0x60] sm:$0xff] }
  0x84   :  { %1299 = vmatprep.mubr.bf16.mxu0 %v1682_v9  ;;  %v641_v9 = vld [vmem:[#allocation3 + $0x8] sm:$0xff]  ;;  %1309 = vmatprep.subr.mxu1 %v912_v60 }
  0x85   :  { %1310 = vmatpush3.msra.mxu1 %v912_v60  ;;  %v900_v60 = vld [vmem:[#allocation9] sm:$0xff] }
  0x8b   :  { %1300 = vmatmul.mubr.bf16.gmra.mxu0 %v1698_v20  ;;  %v911_v20 = vld [vmem:[#allocation9 + $0x58] sm:$0xff] }
  0x8c   :  { %1311 = vmatprep.subr.mxu1 %v911_v20 }
  0x8d   :  { %1312 = vmatpush3.msra.mxu1 %v911_v20 }
  0x8e   :  { %1313 = vmatprep.subr.mxu1 %v910_v52 }
  0x8f   :  { %1314 = vmatpush3.msra.mxu1 %v910_v52 }
  0x90   :  { %1315 = vmatprep.subr.mxu1 %v909_v58 }
  0x91   :  { %1316 = vmatpush3.msra.mxu1 %v909_v58 }
  0x92   :  { %1317 = vmatprep.subr.mxu1 %v908_v41 }
  0x93   :  { %1318 = vmatpush3.msra.mxu1 %v908_v41 }
  0x94   :  { %1319 = vmatprep.subr.mxu1 %v907_v48 }
  0x95   :  { %1320 = vmatpush3.msra.mxu1 %v907_v48 }
  0x96   :  { %1321 = vmatprep.subr.mxu1 %v906_v13 }
  0x97   :  { %1322 = vmatpush3.msra.mxu1 %v906_v13 }
  0x98   :  { %1323 = vmatprep.subr.mxu1 %v905_v45 }
  0x99   :  { %1324 = vmatpush3.msra.mxu1 %v905_v45 }
  0x9a   :  { %1325 = vmatprep.subr.mxu1 %v904_v24 }
  0x9b   :  { %1326 = vmatpush3.msra.mxu1 %v904_v24 }
  0x9c   :  { %1327 = vmatprep.subr.mxu1 %v903_v25 }
  0x9d   :  { %1328 = vmatpush3.msra.mxu1 %v903_v25 }
  0x9e   :  { %1329 = vmatprep.subr.mxu1 %v902_v22 }
  0x9f   :  { %1330 = vmatpush3.msra.mxu1 %v902_v22 }
  0xa0   :  { %1331 = vmatprep.subr.mxu1 %v901_v1 }
  0xa1   :  { %1332 = vmatpush3.msra.mxu1 %v901_v1 }
  0xa2   :  { %1333 = vmatprep.subr.mxu1 %v900_v60 }
  0xa3   :  { %1334 = vmatpush3.msra.mxu1 %v900_v60 }
  0xb4   :  { %v677_v7 = vpop.xlane.xlu1 %676  ;;  %v673_v40 = vpop.xlane.xlu0 %672 }
  0xb5   :  { %v706_v37 = vadd.f32 %v677_v7, %v642_v30  ;;  %v704_v49 = vadd.f32 %v673_v40, %v640_v35  ;;  %v652_v35 = vld [vmem:[#allocation3 + $0x60] sm:$0xff] }
  0xb7   :  { %723 = vst.msk [vmem:[#allocation3 + $0x10] sm:$0xff] %vm98_vm0, %v706_v37  ;;  %721 = vst.msk [vmem:[#allocation3] sm:$0xff] %vm98_vm0, %v704_v49 }
  0xb8   :  { %v679_v46 = vpop.xlane.xlu1 %678  ;;  %v675_v47 = vpop.xlane.xlu0 %674 }
  0xb9   :  { %v707_v51 = vadd.f32 %v679_v46, %v643_v44  ;;  %v705_v36 = vadd.f32 %v675_v47, %v641_v9  ;;  %v655_v44 = vld [vmem:[#allocation3 + $0x78] sm:$0xff]  ;;  %v654_v47 = vld [vmem:[#allocation3 + $0x70] sm:$0xff] }
  0xbb   :  { %724 = vst.msk [vmem:[#allocation3 + $0x18] sm:$0xff] %vm98_vm0, %v707_v51  ;;  %722 = vst.msk [vmem:[#allocation3 + $0x8] sm:$0xff] %vm98_vm0, %v705_v36 }
  0xbc   :  { %v683_v61 = vpop.xlane.xlu1 %682 }
  0xbd   :  { %v709_v62 = vadd.f32 %v683_v61, %v645_v55  ;;  %v681_v29 = vpop.xlane.xlu0 %680 }
  0xbe   :  { %v708_v4 = vadd.f32 %v681_v29, %v644_v28  ;;  %v740_v32 = vld [vmem:[#allocation3] sm:$0xff]  ;;  %v742_v14 = vld [vmem:[#allocation3 + $0x10] sm:$0xff] }
  0xbf   :  { %726 = vst.msk [vmem:[#allocation3 + $0x28] sm:$0xff] %vm98_vm0, %v709_v62  ;;  %1387 = vrcp.f32 %v740_v32 }
  0xc0   :  { %v687_v6 = vpop.xlane.xlu1 %686  ;;  %725 = vst.msk [vmem:[#allocation3 + $0x20] sm:$0xff] %vm98_vm0, %v708_v4 }
  0xc1   :  { %v711_v8 = vadd.f32 %v687_v6, %v647_v63  ;;  %v685_v12 = vpop.xlane.xlu0 %684 }
  0xc2   :  { %v710_v39 = vadd.f32 %v685_v12, %v646_v33  ;;  %v741_v59 = vld [vmem:[#allocation3 + $0x8] sm:$0xff]  ;;  %v743_v19 = vld [vmem:[#allocation3 + $0x18] sm:$0xff] }
  0xc3   :  { %728 = vst.msk [vmem:[#allocation3 + $0x38] sm:$0xff] %vm98_vm0, %v711_v8  ;;  %1389 = vrcp.f32 %v741_v59 }
  0xc4   :  { %v691_v50 = vpop.xlane.xlu1 %690  ;;  %727 = vst.msk [vmem:[#allocation3 + $0x30] sm:$0xff] %vm98_vm0, %v710_v39  ;;  %1391 = vrcp.f32 %v742_v14 }
  0xc5   :  { %v713_v5 = vadd.f32 %v691_v50, %v649_v38  ;;  %v689_v18 = vpop.xlane.xlu0 %688  ;;  %1393 = vrcp.f32 %v743_v19 }
  0xc6   :  { %v712_v57 = vadd.f32 %v689_v18, %v648_v17  ;;  %v745_v46 = vld [vmem:[#allocation3 + $0x28] sm:$0xff] }
  0xc7   :  { %730 = vst.msk [vmem:[#allocation3 + $0x48] sm:$0xff] %vm98_vm0, %v713_v5  ;;  %v744_v30 = vld [vmem:[#allocation3 + $0x20] sm:$0xff] }
  0xc8   :  { %v695_v11 = vpop.xlane.xlu1 %694  ;;  %729 = vst.msk [vmem:[#allocation3 + $0x40] sm:$0xff] %vm98_vm0, %v712_v57  ;;  %1395 = vrcp.f32 %v744_v30 }
  0xc9   :  { %v715_v31 = vadd.f32 %v695_v11, %v651_v56  ;;  %v693_v34 = vpop.xlane.xlu0 %692 }
  0xca   :  { %v714_v2 = vadd.f32 %v693_v34, %v650_v10  ;;  %v747_v63 = vld [vmem:[#allocation3 + $0x38] sm:$0xff] }
  0xcb   :  { %732 = vst.msk [vmem:[#allocation3 + $0x58] sm:$0xff] %vm98_vm0, %v715_v31  ;;  %v746_v62 = vld [vmem:[#allocation3 + $0x30] sm:$0xff] }
  0xcc   :  { %v1388_v7 = vpop.eup %1387  ;;  %v699_v40 = vpop.xlane.xlu1 %698  ;;  %731 = vst.msk [vmem:[#allocation3 + $0x50] sm:$0xff] %vm98_vm0, %v714_v2 }
  0xcd   :  { %v717_v37 = vadd.f32 %v699_v40, %v653_v23  ;;  %806 = vperm.xlu0 %1369, %v1388_v7   ;;  %v697_v49 = vpop.xlane.xlu0 %696 }
  0xce   :  { %v716_v9 = vadd.f32 %v697_v49, %v652_v35  ;;  %v749_v20 = vld [vmem:[#allocation3 + $0x48] sm:$0xff] }
  0xcf   :  { %734 = vst.msk [vmem:[#allocation3 + $0x68] sm:$0xff] %vm98_vm0, %v717_v37  ;;  %1397 = vrcp.f32 %v749_v20  ;;  %v748_v33 = vld [vmem:[#allocation3 + $0x40] sm:$0xff] }
  0xd0   :  { %v1390_v51 = vpop.eup %1389  ;;  %v703_v36 = vpop.xlane.xlu1 %702  ;;  %733 = vst.msk [vmem:[#allocation3 + $0x60] sm:$0xff] %vm98_vm0, %v716_v9  ;;  %1399 = vrcp.f32 %v745_v46 }
  0xd1   :  { %v719_v52 = vadd.f32 %v703_v36, %v655_v44  ;;  %811 = vperm.xlu1 %1370, %v1390_v51   ;;  %v701_v55 = vpop.xlane.xlu0 %700  ;;  %v1392_v28 = vpop.eup %1391 }
  0xd2   :  { %v718_v58 = vadd.f32 %v701_v55, %v654_v47  ;;  %v751_v61 = vld [vmem:[#allocation3 + $0x58] sm:$0xff]  ;;  %v1394_v29 = vpop.eup %1393 }
  0xd3   :  { %736 = vst.msk [vmem:[#allocation3 + $0x78] sm:$0xff] %vm98_vm0, %v719_v52  ;;  %1401 = vrcp.f32 %v751_v61  ;;  %v750_v8 = vld [vmem:[#allocation3 + $0x50] sm:$0xff] }
  0xd4   :  { %735 = vst.msk [vmem:[#allocation3 + $0x70] sm:$0xff] %vm98_vm0, %v718_v58  ;;  %1403 = vrcp.f32 %v746_v62 }
  0xd5   :  { %816 = vperm.xlu1 %1370, %v1392_v28   ;;  %v1396_v4 = vpop.eup %1395 }
  0xd6   :  { %v753_v41 = vld [vmem:[#allocation3 + $0x68] sm:$0xff] }
  0xd7   :  { %1405 = vrcp.f32 %v753_v41  ;;  %v752_v38 = vld [vmem:[#allocation3 + $0x60] sm:$0xff] }
  0xd8   :  { %1407 = vrcp.f32 %v747_v63 }
  0xd9   :  { %821 = vperm.xlu1 %1370, %v1394_v29  }
  0xda   :  { %v755_v32 = vld [vmem:[#allocation3 + $0x78] sm:$0xff] }
  0xdb   :  { %1409 = vrcp.f32 %v755_v32  ;;  %v754_v14 = vld [vmem:[#allocation3 + $0x70] sm:$0xff] }
  0xdc   :  { %v1398_v48 = vpop.eup %1397  ;;  %1411 = vrcp.f32 %v748_v33 }
  0xdd   :  { %826 = vperm.xlu1 %1370, %v1396_v4   ;;  %851 = vperm.xlu0 %1369, %v1398_v48   ;;  %v1400_v6 = vpop.eup %1399  ;;  %1413 = vrcp.f32 %v750_v8 }
  0xde   :  { %1415 = vrcp.f32 %v752_v38 }
  0xdf   :  { %1417 = vrcp.f32 %v754_v14 }
  0xe0   :  { %v1402_v12 = vpop.eup %1401 }
  0xe1   :  { %831 = vperm.xlu1 %1370, %v1400_v6   ;;  %861 = vperm.xlu0 %1369, %v1402_v12   ;;  %v1404_v13 = vpop.eup %1403 }
  0xe4   :  { %v1406_v39 = vpop.eup %1405 }
  0xe5   :  { %836 = vperm.xlu1 %1370, %v1404_v13   ;;  %871 = vperm.xlu0 %1369, %v1406_v39   ;;  %v1408_v59 = vpop.eup %1407 }
  0xe8   :  { %v1410_v17 = vpop.eup %1409 }
  0xe9   :  { %841 = vperm.xlu1 %1370, %v1408_v59   ;;  %881 = vperm.xlu0 %1369, %v1410_v17   ;;  %v1412_v45 = vpop.eup %1411 }
  0xea   :  { %v1414_v50 = vpop.eup %1413 }
  0xeb   :  { %v1416_v5 = vpop.eup %1415 }
  0xec   :  { %v1418_v18 = vpop.eup %1417 }
  0xed   :  { %846 = vperm.xlu1 %1370, %v1412_v45  }
  0xf1   :  { %856 = vperm.xlu1 %1370, %v1414_v50  }
  0xf5   :  { %866 = vperm.xlu1 %1370, %v1416_v5  }
  0xf9   :  { %876 = vperm.xlu1 %1370, %v1418_v18  }
 0x10c   :  { %v1257_v35 = vpop.f32.mrf.mxu1 }
 0x10e   :  { %v432_v40 = vpop.f32.mrf.mxu1 }
 0x110   :  { %v1258_v60 = vpop.f32.mrf.mxu1 }
 0x112   :  { %v435_v20 = vpop.f32.mrf.mxu1 }
 0x113   :  { %v1225_v24 = vpop.f32.mrf.mxu0 }
 0x114   :  { %v441_v29 = vadd.f32 %v1257_v35, %v1225_v24 }
 0x115   :  { %v335_v56 = vpop.f32.mrf.mxu0  ;;  %v1261_v47 = vpop.f32.mrf.mxu1 }
 0x116   :  { %v433_v52 = vadd.f32 %v432_v40, %v335_v56 }
 0x117   :  { %v1226_v57 = vpop.f32.mrf.mxu0  ;;  %v448_v36 = vpop.f32.mrf.mxu1 }
 0x118   :  { %v444_v38 = vadd.f32 %v1258_v60, %v1226_v57 }
 0x119   :  { %v338_v19 = vpop.f32.mrf.mxu0  ;;  %v1262_v58 = vpop.f32.mrf.mxu1 }
 0x11a   :  { %v436_v61 = vadd.f32 %v435_v20, %v338_v19 }
 0x11b   :  { %v1229_v10 = vpop.f32.mrf.mxu0  ;;  %v451_v41 = vpop.f32.mrf.mxu1 }
 0x11d   :  { %v351_v25 = vpop.f32.mrf.mxu0  ;;  %v1265_v8 = vpop.f32.mrf.mxu1 }
 0x11e   :  { %v449_v5 = vadd.f32 %v448_v36, %v351_v25 }
 0x11f   :  { %v1800_v11 = vpop.f32.mrf.mxu0  ;;  %v464_v17 = vpop.f32.mrf.mxu1 }
 0x121   :  { %v354_v31 = vpop.f32.mrf.mxu0  ;;  %v1266_v56 = vpop.f32.mrf.mxu1 }
 0x123   :  { %v1802_v34 = vpop.f32.mrf.mxu0  ;;  %v467_v60 = vpop.f32.mrf.mxu1 }
 0x125   :  { %v1804_v22 = vpop.f32.mrf.mxu0  ;;  %v1269_v36 = vpop.f32.mrf.mxu1 }
 0x127   :  { %v1806_v23 = vpop.f32.mrf.mxu0 }
 0x129   :  { %v1808_v2 = vpop.f32.mrf.mxu0 }
 0x12b   :  { %v1810_v30 = vpop.f32.mrf.mxu0 }
 0x12d   :  { %v1812_v1 = vpop.f32.mrf.mxu0 }
 0x12f   :  { %v1814_v7 = vpop.f32.mrf.mxu0 }
 0x131   :  { %v1816_v37 = vpop.f32.mrf.mxu0 }
 0x133   :  { %v1289_v49 = vpop.f32.mrf.mxu0 }
 0x134   :  { %v594_v6 = vadd.f32 %v1289_v49, %v441_v29  ;;  %v457_v49 = vadd.f32 %v1261_v47, %v1229_v10  ;;  %v480_v10 = vpop.f32.mrf.mxu1 }
 0x135   :  { %v529_v44 = vpop.f32.mrf.mxu0 }
 0x136   :  { %v592_v28 = vadd.f32 %v529_v44, %v433_v52  ;;  %v610_v45 = vadd.f32 %v594_v6, %v1647_v53 }
 0x137   :  { %v1290_v9 = vpop.f32.mrf.mxu0 }
 0x138   :  { %v608_v4 = vadd.f32 %v592_v28, %v1669_v0  ;;  %v595_v14 = vadd.f32 %v1290_v9, %v444_v38 }
 0x139   :  { %v532_v46 = vpop.f32.mrf.mxu0 }
 0x13a   :  { %v593_v63 = vadd.f32 %v532_v46, %v436_v61  ;;  %v611_v19 = vadd.f32 %v595_v14, %v1649_v54  ;;  %v460_v54 = vadd.f32 %v1262_v58, %v1800_v11  ;;  %v481_v14 = vadd.f32 %v480_v10, %v1812_v1 }
 0x13b   :  { %v1293_v51 = vpop.f32.mrf.mxu0 }
 0x13c   :  { %v609_v12 = vadd.f32 %v593_v63, %v1671_v3  ;;  %v452_v3 = vadd.f32 %v451_v41, %v354_v31  ;;  %v598_v46 = vadd.f32 %v1293_v51, %v457_v49  ;;  %v80_v49 = vld [vmem:[#allocation7 + $0x70] sm:$0xff] }
 0x13d   :  { %v545_v55 = vpop.f32.mrf.mxu0 }
 0x13e   :  { %v596_v24 = vadd.f32 %v545_v55, %v449_v5  ;;  %v614_v47 = vadd.f32 %v598_v46, %v1594_v26  ;;  %v476_v26 = vadd.f32 %v1266_v56, %v1806_v23  ;;  %v489_v23 = vadd.f32 %v1269_v36, %v1810_v30  ;;  %v1841_v36 = vld [vmem:[%s1868_s3] ss:$0 sm:$0xff]  ;;  %s1515_s3 = smov [#allocation10]  }
 0x13f   :  { %v1294_v62 = vpop.f32.mrf.mxu0  ;;  %s1105_s7 = sshll.u32 %s1515_s3, 4  ;;  %s1106_s7 = int_to_ptr.vmem [resolvable:$true] %s1105_s7 }
 0x140   :  { %v612_v9 = vadd.f32 %v596_v24, %v1624_v42  ;;  %v599_v61 = vadd.f32 %v1294_v62, %v460_v54  ;;  %v465_v42 = vadd.f32 %v464_v17, %v1804_v22  ;;  %s1480_s8 = scalar_lea.vmem %s1106_s7, 2048  ;;  %p1485_p2 = scmp.lt.s32.totalorder %s1106_s7, %s1106_s7 }
 0x141   :  { %v548_v33 = vpop.f32.mrf.mxu0  ;;  %p1481_p1 = scmp.ne.s32.totalorder %s1106_s7, %s1480_s8  ;;  %p1486_p3 = scmp.lt.s32.totalorder %s1480_s8, %s1480_s8 }
 0x142   :  { %v597_v44 = vadd.f32 %v548_v33, %v452_v3  ;;  %v1270_v33 = vpop.f32.mrf.mxu1  ;;  %v615_v11 = vadd.f32 %v599_v61, %v1596_v27 }
 0x143   :  { %v1297_v39 = vpop.f32.mrf.mxu0  ;;  %v492_v1 = vadd.f32 %v1270_v33, %v1814_v7  ;;  %p1487_p4 = por %p1486_p3, %p1485_p2 }
 0x144   :  { %v613_v52 = vadd.f32 %v597_v44, %v1626_v43  ;;  %v473_v43 = vadd.f32 %v1265_v8, %v1802_v34  ;;  %v483_v22 = vpop.f32.mrf.mxu1 }
 0x145   :  { %v561_v0 = vpop.f32.mrf.mxu0  ;;  %p1488_p5 = pnand %p1487_p4, %p1481_p1 }
 0x147   :  { %v1298_v40 = vpop.f32.mrf.mxu0 }
 0x148   :  { %v807_v32 = vpop.permute.xlu0 %806 }
 0x149   :  { %v884_v48 = vmul.f32 %v807_v32, %v608_v4  ;;  %v564_v20 = vpop.f32.mrf.mxu0  ;;  %v468_v4 = vadd.f32 %v467_v60, %v1808_v2  ;;  %v600_v32 = vadd.f32 %v561_v0, %v465_v42  ;;  %v603_v2 = vadd.f32 %v1298_v40, %v476_v26  ;;  %v1419_v40 = vld [vmem:[#allocation7 + $0x68] sm:$0xff]  ;;  %v81_v60 = vld [vmem:[#allocation7 + $0x78] sm:$0xff] }
 0x14b   :  { %1335 = vmatprep.mubr.f32.mxu1 %v884_v48  ;;  %v1301_v31 = vpop.f32.mrf.mxu0  ;;  %v601_v58 = vadd.f32 %v564_v20, %v468_v4  ;;  %v616_v38 = vadd.f32 %v600_v32, %v1584_v16  ;;  %v619_v16 = vadd.f32 %v603_v2, %v1582_v15 }
 0x14c   :  { %v812_v13 = vpop.permute.xlu1 %811 }
 0x14d   :  { %v885_v59 = vmul.f32 %v812_v13, %v609_v12  ;;  %v577_v41 = vpop.f32.mrf.mxu0  ;;  %v602_v12 = vadd.f32 %v1297_v39, %v473_v43  ;;  %v617_v34 = vadd.f32 %v601_v58, %v1588_v21  ;;  %v78_v21 = vld [vmem:[#allocation7 + $0x60] sm:$0xff] }
 0x14e   :  { %v604_v39 = vadd.f32 %v577_v41, %v481_v14 }
 0x14f   :  { %1336 = vmatmul.mubr.f32.vlgmr.msra.gmra.mxu1 %v885_v59  ;;  %v1302_v48 = vpop.f32.mrf.mxu0  ;;  %v76_v59 = vld [vmem:[#allocation7 + $0x50] sm:$0xff] }
 0x150   :  { %v817_v50 = vpop.permute.xlu1 %816  ;;  %v618_v5 = vadd.f32 %v602_v12, %v76_v59  ;;  %v607_v3 = vadd.f32 %v1302_v48, %v492_v1 }
 0x151   :  { %v886_v18 = vmul.f32 %v817_v50, %v610_v45  ;;  %v580_v27 = vpop.f32.mrf.mxu0  ;;  %v484_v45 = vadd.f32 %v483_v22, %v1816_v37  ;;  %v620_v37 = vadd.f32 %v604_v39, %v78_v21 }
 0x152   :  { %v623_v20 = vadd.f32 %v607_v3, %v81_v60 }
 0x153   :  { %1338 = vmatprep.mubr.f32.mxu1 %v886_v18  ;;  %v605_v0 = vadd.f32 %v580_v27, %v484_v45 }
 0x154   :  { %v822_v35 = vpop.permute.xlu1 %821 }
 0x155   :  { %v887_v57 = vmul.f32 %v822_v35, %v611_v19  ;;  %v606_v35 = vadd.f32 %v1301_v31, %v489_v23  ;;  %v621_v30 = vadd.f32 %v1419_v40, %v605_v0 }
 0x157   :  { %1339 = vmatmul.mubr.f32.gmra.mxu1 %v887_v57 }
 0x158   :  { %v827_v53 = vpop.permute.xlu1 %826  ;;  %v852_v63 = vpop.permute.xlu0 %851 }
 0x159   :  { %v888_v25 = vmul.f32 %v827_v53, %v612_v9  ;;  %v893_v50 = vmul.f32 %v852_v63, %v617_v34  ;;  %v622_v53 = vadd.f32 %v606_v35, %v80_v49 }
 0x15b   :  { %1341 = vmatprep.mubr.f32.mxu1 %v888_v25 }
 0x15c   :  { %v832_v55 = vpop.permute.xlu1 %831  ;;  %v862_v13 = vpop.permute.xlu0 %861 }
 0x15d   :  { %v889_v28 = vmul.f32 %v832_v55, %v613_v52  ;;  %v895_v19 = vmul.f32 %v862_v13, %v619_v16 }
 0x15f   :  { %1342 = vmatmul.mubr.f32.gmra.mxu1 %v889_v28 }
 0x160   :  { %v837_v29 = vpop.permute.xlu1 %836  ;;  %v872_v24 = vpop.permute.xlu0 %871 }
 0x161   :  { %v890_v51 = vmul.f32 %v837_v29, %v614_v47  ;;  %v897_v15 = vmul.f32 %v872_v24, %v621_v30 }
 0x163   :  { %1344 = vmatprep.mubr.f32.mxu1 %v890_v51 }
 0x164   :  { %v842_v62 = vpop.permute.xlu1 %841  ;;  %v882_v9 = vpop.permute.xlu0 %881 }
 0x165   :  { %v891_v6 = vmul.f32 %v842_v62, %v615_v11  ;;  %v899_v46 = vmul.f32 %v882_v9, %v623_v20 }
 0x167   :  { %1345 = vmatmul.mubr.f32.gmra.mxu1 %v891_v6 }
 0x168   :  { %v847_v8 = vpop.permute.xlu1 %846 }
 0x169   :  { %v892_v17 = vmul.f32 %v847_v8, %v616_v38 }
 0x16b   :  { %1347 = vmatprep.mubr.f32.mxu1 %v892_v17 }
 0x16c   :  { %v857_v18 = vpop.permute.xlu1 %856  ;;  %1348 = vmatmul.mubr.f32.gmra.mxu1 %v893_v50 }
 0x16d   :  { %v894_v56 = vmul.f32 %v857_v18, %v618_v5 }
 0x16f   :  { %1350 = vmatprep.mubr.f32.mxu1 %v894_v56 }
 0x170   :  { %v867_v57 = vpop.permute.xlu1 %866  ;;  %1351 = vmatmul.mubr.f32.gmra.mxu1 %v895_v19 }
 0x171   :  { %v896_v44 = vmul.f32 %v867_v57, %v620_v37 }
 0x173   :  { %1353 = vmatprep.mubr.f32.mxu1 %v896_v44 }
 0x174   :  { %v877_v25 = vpop.permute.xlu1 %876  ;;  %1354 = vmatmul.mubr.f32.gmra.mxu1 %v897_v15 }
 0x175   :  { %v898_v7 = vmul.f32 %v877_v25, %v622_v53 }
 0x177   :  { %1356 = vmatprep.mubr.f32.mxu1 %v898_v7 }
 0x178   :  { %1357 = vmatmul.mubr.f32.gmra.mxu1 %v899_v46 }
 0x20f   :  { %v1337_v52 = vpop.f32.mrf.mxu1 }
 0x210   :  { %v995_v55 = vadd.f32 %v1337_v52, %v1841_v36 }
 0x211   :  { %v989_v54 = vpop.f32.mrf.mxu1 }
 0x212   :  { %v1069_v31 = vmax.f32 %v995_v55, 0.0  ;;  %v990_v28 = vadd.f32 %v1841_v36, %v989_v54 }
 0x214   :  { %1085 = vst [vmem:[#allocation10 + $0x8] sm:$0xff] %v1069_v31  ;;  %v1068_v61 = vmax.f32 %v990_v28, 0.0 }
 0x216   :  { %1084 = vst [vmem:[#allocation10] sm:$0xff] %v1068_v61 }
 0x217   :  { %v1340_v10 = vpop.f32.mrf.mxu1 }
 0x218   :  { %v1005_v47 = vadd.f32 %v1340_v10, %v1841_v36 }
 0x219   :  { %v999_v29 = vpop.f32.mrf.mxu1 }
 0x21a   :  { %v1071_v42 = vmax.f32 %v1005_v47, 0.0  ;;  %v1000_v41 = vadd.f32 %v1841_v36, %v999_v29 }
 0x21c   :  { %1087 = vst [vmem:[#allocation10 + $0x18] sm:$0xff] %v1071_v42  ;;  %v1070_v63 = vmax.f32 %v1000_v41, 0.0 }
 0x21e   :  { %1086 = vst [vmem:[#allocation10 + $0x10] sm:$0xff] %v1070_v63 }
 0x21f   :  { %v1343_v51 = vpop.f32.mrf.mxu1 }
 0x220   :  { %v1015_v4 = vadd.f32 %v1343_v51, %v1841_v36 }
 0x221   :  { %v1009_v43 = vpop.f32.mrf.mxu1 }
 0x222   :  { %v1073_v32 = vmax.f32 %v1015_v4, 0.0  ;;  %v1010_v33 = vadd.f32 %v1841_v36, %v1009_v43 }
 0x224   :  { %1089 = vst [vmem:[#allocation10 + $0x28] sm:$0xff] %v1073_v32  ;;  %v1072_v11 = vmax.f32 %v1010_v33, 0.0 }
 0x226   :  { %1088 = vst [vmem:[#allocation10 + $0x20] sm:$0xff] %v1072_v11 }
 0x227   :  { %v1346_v58 = vpop.f32.mrf.mxu1 }
 0x228   :  { %v1025_v62 = vadd.f32 %v1346_v58, %v1841_v36 }
 0x229   :  { %v1019_v48 = vpop.f32.mrf.mxu1 }
 0x22a   :  { %v1075_v6 = vmax.f32 %v1025_v62, 0.0  ;;  %v1020_v26 = vadd.f32 %v1841_v36, %v1019_v48 }
 0x22c   :  { %1091 = vst [vmem:[#allocation10 + $0x38] sm:$0xff] %v1075_v6  ;;  %v1074_v12 = vmax.f32 %v1020_v26, 0.0  ;;  %v1349_v22 = vpop.f32.mrf.mxu1 }
 0x22d   :  { %v1035_v13 = vadd.f32 %v1349_v22, %v1841_v36 }
 0x22e   :  { %1090 = vst [vmem:[#allocation10 + $0x30] sm:$0xff] %v1074_v12  ;;  %v1029_v38 = vpop.f32.mrf.mxu1 }
 0x22f   :  { %v1077_v2 = vmax.f32 %v1035_v13, 0.0  ;;  %v1030_v34 = vadd.f32 %v1841_v36, %v1029_v38 }
 0x230   :  { %v1352_v8 = vpop.f32.mrf.mxu1 }
 0x231   :  { %1093 = vst [vmem:[#allocation10 + $0x48] sm:$0xff] %v1077_v2  ;;  %v1076_v59 = vmax.f32 %v1030_v34, 0.0  ;;  %v1045_v14 = vadd.f32 %v1352_v8, %v1841_v36 }
 0x232   :  { %v1039_v27 = vpop.f32.mrf.mxu1 }
 0x233   :  { %1092 = vst [vmem:[#allocation10 + $0x40] sm:$0xff] %v1076_v59  ;;  %v1079_v17 = vmax.f32 %v1045_v14, 0.0  ;;  %v1040_v45 = vadd.f32 %v1841_v36, %v1039_v27 }
 0x234   :  { %v1355_v50 = vpop.f32.mrf.mxu1 }
 0x235   :  { %1095 = vst [vmem:[#allocation10 + $0x58] sm:$0xff] %v1079_v17  ;;  %v1078_v23 = vmax.f32 %v1040_v45, 0.0  ;;  %v1055_v39 = vadd.f32 %v1355_v50, %v1841_v36 }
 0x236   :  { %v1049_v5 = vpop.f32.mrf.mxu1 }
 0x237   :  { %1094 = vst [vmem:[#allocation10 + $0x50] sm:$0xff] %v1078_v23  ;;  %v1081_v0 = vmax.f32 %v1055_v39, 0.0  ;;  %v1050_v16 = vadd.f32 %v1841_v36, %v1049_v5 }
 0x238   :  { %v1358_v18 = vpop.f32.mrf.mxu1 }
 0x239   :  { %1097 = vst [vmem:[#allocation10 + $0x68] sm:$0xff] %v1081_v0  ;;  %v1080_v21 = vmax.f32 %v1050_v16, 0.0  ;;  %v1065_v24 = vadd.f32 %v1358_v18, %v1841_v36 }
 0x23a   :  { %v1059_v56 = vpop.f32.mrf.mxu1 }
 0x23b   :  { %1096 = vst [vmem:[#allocation10 + $0x60] sm:$0xff] %v1080_v21  ;;  %v1083_v1 = vmax.f32 %v1065_v24, 0.0  ;;  %v1060_v19 = vadd.f32 %v1841_v36, %v1059_v56 }
 0x23d   :  { %1099 = vst [vmem:[#allocation10 + $0x78] sm:$0xff] %v1083_v1  ;;  %v1082_v35 = vmax.f32 %v1060_v19, 0.0 }
 0x23f   :  { %1098 = vst [vmem:[#allocation10 + $0x70] sm:$0xff] %v1082_v35 }
 0x240   :  { %1491 = shalt.err (!%p1488_p5)
}
 0x241   :  { %1111 = dma.vmem_to_hbm [thread:$0]  %s1106_s7, 2048, %s1869_s4, [#allocation6], %s1507_s18, %s1507_s18, %s1508_s19  }
 0x242   :  { %1504 = dma.done.wait [#allocation6], 2048  }
 0x243   :  { %1505 = vsyncadd [#allocation6], 4294965248 }
 0x244   :  { %1115 = vsyncpa [#allocation5], 1 }
 0x245   :  { %1116 = vsyncpa [#allocation8], 1 }
 0x246   :  { %1117 = vsyncpa [#allocation6], 1 }

</bundles_post_ra>
